<compile_context>
chip_gen: v7x
topology: tpu7x:2x2x1
jax: 0.10.0
libtpu: 0.0.40
codegen_flags: <defaults>
</compile_context>

<pallas_src>
import numpy as np
import jax
import jax.numpy as jnp
from jax.experimental import pallas as pl
from jax.experimental.pallas import tpu as pltpu

EPS = 1e-5


def resblock_kernel(x_ref, w1a_ref, g1_ref, be1_ref, w2_ref, g2_ref, be2_ref,
                    bt_ref, o_ref):
    N, C_in, L = x_ref.shape
    C_out = o_ref.shape[1]
    NL = N * L
    inv_cnt = 1.0 / float(NL)

    w1a = w1a_ref[...]                   # (2*C_out, 3*C_in): [w1 taps ; 1x1 shortcut]
    w2 = w2_ref[...]                     # (C_out, 3*C_out)
    bt = bt_ref[...]                     # (C_out, 1)

    # Banded, per-batch block-diagonal shift matrices over the flattened
    # (batch, length) lane axis: right-multiplying shifts columns by +/-1 with
    # zero fill at each batch element's edges (== 'same'/padding=1 taps).
    row = jax.lax.broadcasted_iota(jnp.int32, (NL, NL), 0)
    col = jax.lax.broadcasted_iota(jnp.int32, (NL, NL), 1)
    s_prev = jnp.where((col == row + 1) & (col % L != 0), 1.0, 0.0)        # -> x[:, l-1]
    s_next = jnp.where((row == col + 1) & (col % L != (L - 1)), 1.0, 0.0)  # -> x[:, l+1]

    def conv_taps(v):
        # v: (C, N*L) -> im2col slab (3*C, N*L), row blocks ordered [k=0 | k=1 | k=2].
        prev = jnp.dot(v, s_prev, preferred_element_type=jnp.float32)
        nxt = jnp.dot(v, s_next, preferred_element_type=jnp.float32)
        return jnp.concatenate([prev, v, nxt], axis=0)

    # Flatten the batch onto the lane axis: (C_in, N*L).
    xs = jnp.concatenate([x_ref[n] for n in range(N)], axis=1)

    # ---- conv1 (k=3, padding='same') + 1x1 shortcut in ONE contraction ----
    y1 = jnp.dot(w1a, conv_taps(xs), preferred_element_type=jnp.float32)   # (2*C_out, NL)
    h = y1[:C_out, :]                                                      # conv1 pre-BN
    xt = y1[C_out:, :] + bt                                                # shortcut branch

    # ---- BN1 (training-mode batch stats) folded into a per-channel affine ----
    s1 = jnp.sum(h, axis=1, keepdims=True)
    q1 = jnp.sum(h * h, axis=1, keepdims=True)
    mu1 = s1 * inv_cnt
    var1 = jnp.maximum(q1 * inv_cnt - mu1 * mu1, 0.0)
    scale1 = g1_ref[...] * jax.lax.rsqrt(var1 + EPS)                       # (C_out, 1)
    shift1 = be1_ref[...] - mu1 * scale1

    # ---- ReLU -> conv2 (k=3, stride=1, padding=1) ----
    a = jnp.maximum(h * scale1 + shift1, 0.0)
    h2 = jnp.dot(w2, conv_taps(a), preferred_element_type=jnp.float32)     # (C_out, NL)

    # ---- BN2 folded affine ----
    s2 = jnp.sum(h2, axis=1, keepdims=True)
    q2 = jnp.sum(h2 * h2, axis=1, keepdims=True)
    mu2 = s2 * inv_cnt
    var2 = jnp.maximum(q2 * inv_cnt - mu2 * mu2, 0.0)
    scale2 = g2_ref[...] * jax.lax.rsqrt(var2 + EPS)
    shift2 = be2_ref[...] - mu2 * scale2

    # ---- residual add + final ReLU, stored directly in NCL ----
    out = jnp.maximum(h2 * scale2 + shift2 + xt, 0.0)                      # (C_out, NL)
    for n in range(N):
        o_ref[n, :, :] = out[:, n * L:(n + 1) * L].astype(o_ref.dtype)


def resblock_forward(x_ncl, params):
    """x_ncl: (N, C_in, L) float32 (PyTorch layout); returns (N, C_out, L) float32."""
    N, C_in, L = x_ncl.shape
    C_out = params["w1"].shape[0]

    # Fold PyTorch conv weights (C_out, C, K=3) -> (C_out, K*C) matching the
    # kernel's im2col row order [tap k=0 | k=1 | k=2], and pack the 1x1 shortcut
    # weight (centre tap only) below w1 so conv1 + shortcut share one matmul.
    w1f = jnp.transpose(params["w1"], (0, 2, 1)).reshape(C_out, 3 * C_in)
    w2f = jnp.transpose(params["w2"], (0, 2, 1)).reshape(C_out, 3 * C_out)
    wtm = params["wt"][:, :, 0]                                   # (C_out, C_in)
    zero = jnp.zeros((C_out, C_in), jnp.float32)
    w1aug = jnp.concatenate(
        [w1f, jnp.concatenate([zero, wtm, zero], axis=1)], axis=0)  # (2*C_out, 3*C_in)

    def col(v):                                                   # (C,) -> (C, 1)
        return v.reshape(-1, 1)

    # VMEM footprint (all f32): input + im2col slabs + intermediates + the
    # (N*L, N*L) shift matrices, plus headroom for (8,128)-vreg padding of the
    # tiny per-channel parameter tensors.
    est = 4 * (N * L * (6 * C_in + 14 * C_out) + 2 * (N * L) ** 2) + (8 << 20)
    vmem_bytes = int(min(max(est, 16 << 20), 48 << 20))           # under v7x's 64 MiB VMEM

    vmem = pl.BlockSpec(memory_space=pltpu.MemorySpace.VMEM)
    return pl.pallas_call(
        resblock_kernel,
        out_shape=jax.ShapeDtypeStruct((N, C_out, L), jnp.float32),
        in_specs=[vmem] * 8,
        out_specs=vmem,
        compiler_params=pltpu.CompilerParams(vmem_limit_bytes=vmem_bytes),
    )(x_ncl, w1aug, col(params["g1"]), col(params["be1"]),
      w2f, col(params["g2"]), col(params["be2"]), col(params["bt"]))


# ------------------------- pure-JAX reference (for checking) -------------------------
def ref_forward(x, p):
    dn = ("NCH", "OIH", "NCH")

    def conv1d(x, w, b, padding):
        y = jax.lax.conv_general_dilated(x, w, (1,), padding, dimension_numbers=dn)
        return y + b[None, :, None]

    def bn_train(x, g, b):
        mu = jnp.mean(x, axis=(0, 2), keepdims=True)
        var = jnp.mean((x - mu) ** 2, axis=(0, 2), keepdims=True)
        return (x - mu) / jnp.sqrt(var + EPS) * g[None, :, None] + b[None, :, None]

    h = conv1d(x, p["w1"], p["b1"], [(1, 1)])
    h = jax.nn.relu(bn_train(h, p["g1"], p["be1"]))
    h = conv1d(h, p["w2"], p["b2"], [(1, 1)])
    h = bn_train(h, p["g2"], p["be2"])
    xt = conv1d(x, p["wt"], p["bt"], [(0, 0)])
    return jax.nn.relu(h + xt)


if __name__ == "__main__":
    N, C_IN, C_OUT, L = 2, 4, 8, 16

    key = jax.random.PRNGKey(0)
    ks = jax.random.split(key, 8)
    params = {
        # conv1: Conv1d(in, out, k=3, padding='same')
        "w1": 0.2 * jax.random.normal(ks[0], (C_OUT, C_IN, 3), jnp.float32),
        "b1": 0.1 * jax.random.normal(ks[1], (C_OUT,), jnp.float32),   # reference only:
        # BN1 default init                                             # cancels in train-mode BN
        "g1": jnp.ones((C_OUT,), jnp.float32),
        "be1": jnp.zeros((C_OUT,), jnp.float32),
        # conv2: Conv1d(out, out, k=3, stride=1, padding=1)
        "w2": 0.2 * jax.random.normal(ks[2], (C_OUT, C_OUT, 3), jnp.float32),
        "b2": 0.1 * jax.random.normal(ks[3], (C_OUT,), jnp.float32),   # reference only
        # BN2 default init
        "g2": jnp.ones((C_OUT,), jnp.float32),
        "be2": jnp.zeros((C_OUT,), jnp.float32),
        # x_transform: Conv1d(in, out, k=1)
        "wt": 0.2 * jax.random.normal(ks[4], (C_OUT, C_IN, 1), jnp.float32),
        "bt": 0.1 * jax.random.normal(ks[5], (C_OUT,), jnp.float32),
    }

    x = jax.random.normal(ks[6], (N, C_IN, L), jnp.float32)

    out = resblock_forward(x, params)
    out = jax.block_until_ready(out)

    ref = jax.block_until_ready(ref_forward(x, params))
    np.testing.assert_allclose(np.asarray(out), np.asarray(ref), rtol=1e-4, atol=1e-4)

    print("KERNEL_OK")
</pallas_src>

<mosaic_0001>
module attributes {stable_mosaic.version = 11 : i64} {
  func.func @resblock_kernel(%arg0: memref<2x4x16xf32, #tpu.memory_space<vmem>>, %arg1: memref<16x12xf32, #tpu.memory_space<vmem>>, %arg2: memref<8x1xf32, #tpu.memory_space<vmem>>, %arg3: memref<8x1xf32, #tpu.memory_space<vmem>>, %arg4: memref<8x24xf32, #tpu.memory_space<vmem>>, %arg5: memref<8x1xf32, #tpu.memory_space<vmem>>, %arg6: memref<8x1xf32, #tpu.memory_space<vmem>>, %arg7: memref<8x1xf32, #tpu.memory_space<vmem>>, %arg8: memref<2x8x16xf32, #tpu.memory_space<vmem>>) attributes {dimension_semantics = [], scalar_prefetch = 0 : i64, scratch_operands = 0 : i64, tpu.core_type = #tpu.core_type<tc>} {
    %c0 = arith.constant 0 : index
    %c0_0 = arith.constant 0 : index
    %0 = vector.load %arg1[%c0, %c0_0] : memref<16x12xf32, #tpu.memory_space<vmem>>, vector<16x12xf32>
    %c0_1 = arith.constant 0 : index
    %c0_2 = arith.constant 0 : index
    %1 = vector.load %arg4[%c0_1, %c0_2] : memref<8x24xf32, #tpu.memory_space<vmem>>, vector<8x24xf32>
    %c0_3 = arith.constant 0 : index
    %c0_4 = arith.constant 0 : index
    %2 = vector.load %arg7[%c0_3, %c0_4] : memref<8x1xf32, #tpu.memory_space<vmem>>, vector<8x1xf32>
    %3 = tpu.iota {dimensions = array<i32: 0>} : vector<32x32xi32>
    %4 = tpu.iota {dimensions = array<i32: 1>} : vector<32x32xi32>
    %c1_i32 = arith.constant 1 : i32
    %5 = vector.broadcast %c1_i32 : i32 to vector<32x32xi32>
    %6 = arith.addi %3, %5 : vector<32x32xi32>
    %7 = arith.cmpi eq, %4, %6 : vector<32x32xi32>
    %c16_i32 = arith.constant 16 : i32
    %c0_i32 = arith.constant 0 : i32
    %8 = arith.cmpi eq, %c16_i32, %c0_i32 : i32
    %c1_i32_5 = arith.constant 1 : i32
    %9 = arith.select %8, %c1_i32_5, %c16_i32 : i32
    %10 = vector.broadcast %9 : i32 to vector<32x32xi32>
    %11 = arith.remsi %4, %10 : vector<32x32xi32>
    %c0_i32_6 = arith.constant 0 : i32
    %12 = vector.broadcast %c0_i32_6 : i32 to vector<32x32xi32>
    %13 = arith.cmpi ne, %11, %12 : vector<32x32xi32>
    %c0_i32_7 = arith.constant 0 : i32
    %14 = vector.broadcast %c0_i32_7 : i32 to vector<32x32xi32>
    %15 = arith.cmpi slt, %11, %14 : vector<32x32xi32>
    %c0_i32_8 = arith.constant 0 : i32
    %16 = arith.cmpi slt, %9, %c0_i32_8 : i32
    %17 = vector.broadcast %16 : i1 to vector<32x32xi1>
    %18 = vector.broadcast %17 : vector<32x32xi1> to vector<32x32xi1>
    %19 = arith.xori %15, %18 : vector<32x32xi1>
    %20 = arith.andi %19, %13 : vector<32x32xi1>
    %21 = vector.broadcast %9 : i32 to vector<32x32xi32>
    %22 = arith.addi %11, %21 : vector<32x32xi32>
    %23 = arith.select %20, %22, %11 : vector<32x32xi1>, vector<32x32xi32>
    %c0_i32_9 = arith.constant 0 : i32
    %24 = vector.broadcast %c0_i32_9 : i32 to vector<32x32xi32>
    %25 = arith.cmpi ne, %23, %24 : vector<32x32xi32>
    %26 = arith.andi %7, %25 : vector<32x32xi1>
    %cst = arith.constant 1.000000e+00 : f32
    %cst_10 = arith.constant 0.000000e+00 : f32
    %27 = vector.broadcast %cst : f32 to vector<32x32xf32>
    %28 = vector.broadcast %cst_10 : f32 to vector<32x32xf32>
    %29 = arith.select %26, %27, %28 : vector<32x32xi1>, vector<32x32xf32>
    %c1_i32_11 = arith.constant 1 : i32
    %30 = vector.broadcast %c1_i32_11 : i32 to vector<32x32xi32>
    %31 = arith.addi %4, %30 : vector<32x32xi32>
    %32 = arith.cmpi eq, %3, %31 : vector<32x32xi32>
    %c16_i32_12 = arith.constant 16 : i32
    %c0_i32_13 = arith.constant 0 : i32
    %33 = arith.cmpi eq, %c16_i32_12, %c0_i32_13 : i32
    %c1_i32_14 = arith.constant 1 : i32
    %34 = arith.select %33, %c1_i32_14, %c16_i32_12 : i32
    %35 = vector.broadcast %34 : i32 to vector<32x32xi32>
    %36 = arith.remsi %4, %35 : vector<32x32xi32>
    %c0_i32_15 = arith.constant 0 : i32
    %37 = vector.broadcast %c0_i32_15 : i32 to vector<32x32xi32>
    %38 = arith.cmpi ne, %36, %37 : vector<32x32xi32>
    %c0_i32_16 = arith.constant 0 : i32
    %39 = vector.broadcast %c0_i32_16 : i32 to vector<32x32xi32>
    %40 = arith.cmpi slt, %36, %39 : vector<32x32xi32>
    %c0_i32_17 = arith.constant 0 : i32
    %41 = arith.cmpi slt, %34, %c0_i32_17 : i32
    %42 = vector.broadcast %41 : i1 to vector<32x32xi1>
    %43 = vector.broadcast %42 : vector<32x32xi1> to vector<32x32xi1>
    %44 = arith.xori %40, %43 : vector<32x32xi1>
    %45 = arith.andi %44, %38 : vector<32x32xi1>
    %46 = vector.broadcast %34 : i32 to vector<32x32xi32>
    %47 = arith.addi %36, %46 : vector<32x32xi32>
    %48 = arith.select %45, %47, %36 : vector<32x32xi1>, vector<32x32xi32>
    %c15_i32 = arith.constant 15 : i32
    %49 = vector.broadcast %c15_i32 : i32 to vector<32x32xi32>
    %50 = arith.cmpi ne, %48, %49 : vector<32x32xi32>
    %51 = arith.andi %32, %50 : vector<32x32xi1>
    %cst_18 = arith.constant 1.000000e+00 : f32
    %cst_19 = arith.constant 0.000000e+00 : f32
    %52 = vector.broadcast %cst_18 : f32 to vector<32x32xf32>
    %53 = vector.broadcast %cst_19 : f32 to vector<32x32xf32>
    %54 = arith.select %51, %52, %53 : vector<32x32xi1>, vector<32x32xf32>
    %c0_20 = arith.constant 0 : index
    %c0_21 = arith.constant 0 : index
    %c0_22 = arith.constant 0 : index
    %55 = vector.load %arg0[%c0_20, %c0_21, %c0_22] : memref<2x4x16xf32, #tpu.memory_space<vmem>>, vector<1x4x16xf32>
    %56 = vector.shape_cast %55 : vector<1x4x16xf32> to vector<4x16xf32>
    %c1 = arith.constant 1 : index
    %c0_23 = arith.constant 0 : index
    %c0_24 = arith.constant 0 : index
    %57 = vector.load %arg0[%c1, %c0_23, %c0_24] : memref<2x4x16xf32, #tpu.memory_space<vmem>>, vector<1x4x16xf32>
    %58 = vector.shape_cast %57 : vector<1x4x16xf32> to vector<4x16xf32>
    %59 = tpu.concatenate %56, %58 in 1 : vector<4x16xf32>, vector<4x16xf32> -> vector<4x32xf32>
    %cst_25 = arith.constant dense<0.000000e+00> : vector<4x32xf32>
    %60 = tpu.matmul %59, %29, %cst_25 {dimension_numbers = #tpu.dot_dimension_numbers<[1], [0], [0], [1], [0, 0, 1, 1], [], []>} : vector<4x32xf32>, vector<32x32xf32>, vector<4x32xf32> -> vector<4x32xf32>
    %cst_26 = arith.constant dense<0.000000e+00> : vector<4x32xf32>
    %61 = tpu.matmul %59, %54, %cst_26 {dimension_numbers = #tpu.dot_dimension_numbers<[1], [0], [0], [1], [0, 0, 1, 1], [], []>} : vector<4x32xf32>, vector<32x32xf32>, vector<4x32xf32> -> vector<4x32xf32>
    %62 = tpu.concatenate %60, %59, %61 in 0 : vector<4x32xf32>, vector<4x32xf32>, vector<4x32xf32> -> vector<12x32xf32>
    %cst_27 = arith.constant dense<0.000000e+00> : vector<16x32xf32>
    %63 = tpu.matmul %0, %62, %cst_27 {dimension_numbers = #tpu.dot_dimension_numbers<[1], [0], [0], [1], [0, 0, 1, 1], [], []>} : vector<16x12xf32>, vector<12x32xf32>, vector<16x32xf32> -> vector<16x32xf32>
    %64 = vector.extract_strided_slice %63 {offsets = [0, 0], sizes = [8, 32], strides = [1, 1]} : vector<16x32xf32> to vector<8x32xf32>
    %65 = vector.extract_strided_slice %63 {offsets = [8, 0], sizes = [8, 32], strides = [1, 1]} : vector<16x32xf32> to vector<8x32xf32>
    %66 = vector.broadcast %2 : vector<8x1xf32> to vector<8x32xf32>
    %67 = arith.addf %65, %66 : vector<8x32xf32>
    %cst_28 = arith.constant dense<0.000000e+00> : vector<8xf32>
    %68 = vector.multi_reduction <add>, %64, %cst_28 [1] : vector<8x32xf32> to vector<8xf32>
    %69 = vector.shape_cast %68 : vector<8xf32> to vector<8x1xf32>
    %70 = arith.mulf %64, %64 : vector<8x32xf32>
    %cst_29 = arith.constant dense<0.000000e+00> : vector<8xf32>
    %71 = vector.multi_reduction <add>, %70, %cst_29 [1] : vector<8x32xf32> to vector<8xf32>
    %72 = vector.shape_cast %71 : vector<8xf32> to vector<8x1xf32>
    %cst_30 = arith.constant 3.125000e-02 : f32
    %73 = vector.broadcast %cst_30 : f32 to vector<8x1xf32>
    %74 = arith.mulf %69, %73 : vector<8x1xf32>
    %cst_31 = arith.constant 3.125000e-02 : f32
    %75 = vector.broadcast %cst_31 : f32 to vector<8x1xf32>
    %76 = arith.mulf %72, %75 : vector<8x1xf32>
    %77 = arith.mulf %74, %74 : vector<8x1xf32>
    %78 = arith.subf %76, %77 : vector<8x1xf32>
    %cst_32 = arith.constant 0.000000e+00 : f32
    %79 = vector.broadcast %cst_32 : f32 to vector<8x1xf32>
    %80 = arith.maximumf %78, %79 : vector<8x1xf32>
    %c0_33 = arith.constant 0 : index
    %c0_34 = arith.constant 0 : index
    %81 = vector.load %arg2[%c0_33, %c0_34] : memref<8x1xf32, #tpu.memory_space<vmem>>, vector<8x1xf32>
    %cst_35 = arith.constant 9.99999974E-6 : f32
    %82 = vector.broadcast %cst_35 : f32 to vector<8x1xf32>
    %83 = arith.addf %80, %82 : vector<8x1xf32>
    %84 = math.rsqrt %83 : vector<8x1xf32>
    %85 = arith.mulf %81, %84 : vector<8x1xf32>
    %c0_36 = arith.constant 0 : index
    %c0_37 = arith.constant 0 : index
    %86 = vector.load %arg3[%c0_36, %c0_37] : memref<8x1xf32, #tpu.memory_space<vmem>>, vector<8x1xf32>
    %87 = arith.mulf %74, %85 : vector<8x1xf32>
    %88 = arith.subf %86, %87 : vector<8x1xf32>
    %89 = vector.broadcast %85 : vector<8x1xf32> to vector<8x32xf32>
    %90 = arith.mulf %64, %89 : vector<8x32xf32>
    %91 = vector.broadcast %88 : vector<8x1xf32> to vector<8x32xf32>
    %92 = arith.addf %90, %91 : vector<8x32xf32>
    %cst_38 = arith.constant 0.000000e+00 : f32
    %93 = vector.broadcast %cst_38 : f32 to vector<8x32xf32>
    %94 = arith.maximumf %92, %93 : vector<8x32xf32>
    %cst_39 = arith.constant dense<0.000000e+00> : vector<8x32xf32>
    %95 = tpu.matmul %94, %29, %cst_39 {dimension_numbers = #tpu.dot_dimension_numbers<[1], [0], [0], [1], [0, 0, 1, 1], [], []>} : vector<8x32xf32>, vector<32x32xf32>, vector<8x32xf32> -> vector<8x32xf32>
    %cst_40 = arith.constant dense<0.000000e+00> : vector<8x32xf32>
    %96 = tpu.matmul %94, %54, %cst_40 {dimension_numbers = #tpu.dot_dimension_numbers<[1], [0], [0], [1], [0, 0, 1, 1], [], []>} : vector<8x32xf32>, vector<32x32xf32>, vector<8x32xf32> -> vector<8x32xf32>
    %97 = tpu.concatenate %95, %94, %96 in 0 : vector<8x32xf32>, vector<8x32xf32>, vector<8x32xf32> -> vector<24x32xf32>
    %cst_41 = arith.constant dense<0.000000e+00> : vector<8x32xf32>
    %98 = tpu.matmul %1, %97, %cst_41 {dimension_numbers = #tpu.dot_dimension_numbers<[1], [0], [0], [1], [0, 0, 1, 1], [], []>} : vector<8x24xf32>, vector<24x32xf32>, vector<8x32xf32> -> vector<8x32xf32>
    %cst_42 = arith.constant dense<0.000000e+00> : vector<8xf32>
    %99 = vector.multi_reduction <add>, %98, %cst_42 [1] : vector<8x32xf32> to vector<8xf32>
    %100 = vector.shape_cast %99 : vector<8xf32> to vector<8x1xf32>
    %101 = arith.mulf %98, %98 : vector<8x32xf32>
    %cst_43 = arith.constant dense<0.000000e+00> : vector<8xf32>
    %102 = vector.multi_reduction <add>, %101, %cst_43 [1] : vector<8x32xf32> to vector<8xf32>
    %103 = vector.shape_cast %102 : vector<8xf32> to vector<8x1xf32>
    %cst_44 = arith.constant 3.125000e-02 : f32
    %104 = vector.broadcast %cst_44 : f32 to vector<8x1xf32>
    %105 = arith.mulf %100, %104 : vector<8x1xf32>
    %cst_45 = arith.constant 3.125000e-02 : f32
    %106 = vector.broadcast %cst_45 : f32 to vector<8x1xf32>
    %107 = arith.mulf %103, %106 : vector<8x1xf32>
    %108 = arith.mulf %105, %105 : vector<8x1xf32>
    %109 = arith.subf %107, %108 : vector<8x1xf32>
    %cst_46 = arith.constant 0.000000e+00 : f32
    %110 = vector.broadcast %cst_46 : f32 to vector<8x1xf32>
    %111 = arith.maximumf %109, %110 : vector<8x1xf32>
    %c0_47 = arith.constant 0 : index
    %c0_48 = arith.constant 0 : index
    %112 = vector.load %arg5[%c0_47, %c0_48] : memref<8x1xf32, #tpu.memory_space<vmem>>, vector<8x1xf32>
    %cst_49 = arith.constant 9.99999974E-6 : f32
    %113 = vector.broadcast %cst_49 : f32 to vector<8x1xf32>
    %114 = arith.addf %111, %113 : vector<8x1xf32>
    %115 = math.rsqrt %114 : vector<8x1xf32>
    %116 = arith.mulf %112, %115 : vector<8x1xf32>
    %c0_50 = arith.constant 0 : index
    %c0_51 = arith.constant 0 : index
    %117 = vector.load %arg6[%c0_50, %c0_51] : memref<8x1xf32, #tpu.memory_space<vmem>>, vector<8x1xf32>
    %118 = arith.mulf %105, %116 : vector<8x1xf32>
    %119 = arith.subf %117, %118 : vector<8x1xf32>
    %120 = vector.broadcast %116 : vector<8x1xf32> to vector<8x32xf32>
    %121 = arith.mulf %98, %120 : vector<8x32xf32>
    %122 = vector.broadcast %119 : vector<8x1xf32> to vector<8x32xf32>
    %123 = arith.addf %121, %122 : vector<8x32xf32>
    %124 = arith.addf %123, %67 : vector<8x32xf32>
    %cst_52 = arith.constant 0.000000e+00 : f32
    %125 = vector.broadcast %cst_52 : f32 to vector<8x32xf32>
    %126 = arith.maximumf %124, %125 : vector<8x32xf32>
    %127 = vector.extract_strided_slice %126 {offsets = [0, 0], sizes = [8, 16], strides = [1, 1]} : vector<8x32xf32> to vector<8x16xf32>
    %c0_53 = arith.constant 0 : index
    %c0_54 = arith.constant 0 : index
    %c0_55 = arith.constant 0 : index
    %128 = vector.load %arg8[%c0_53, %c0_54, %c0_55] : memref<2x8x16xf32, #tpu.memory_space<vmem>>, vector<1x8x16xf32>
    %129 = vector.shape_cast %128 : vector<1x8x16xf32> to vector<8x16xf32>
    %130 = vector.shape_cast %127 : vector<8x16xf32> to vector<1x8x16xf32>
    tpu.vector_store %arg8[%c0_53, %c0_54, %c0_55], %130 {strides = array<i32>} : memref<2x8x16xf32, #tpu.memory_space<vmem>>, vector<1x8x16xf32>,
    %131 = vector.extract_strided_slice %126 {offsets = [0, 16], sizes = [8, 16], strides = [1, 1]} : vector<8x32xf32> to vector<8x16xf32>
    %c1_56 = arith.constant 1 : index
    %c0_57 = arith.constant 0 : index
    %c0_58 = arith.constant 0 : index
    %132 = vector.load %arg8[%c1_56, %c0_57, %c0_58] : memref<2x8x16xf32, #tpu.memory_space<vmem>>, vector<1x8x16xf32>
    %133 = vector.shape_cast %132 : vector<1x8x16xf32> to vector<8x16xf32>
    %134 = vector.shape_cast %131 : vector<8x16xf32> to vector<1x8x16xf32>
    tpu.vector_store %arg8[%c1_56, %c0_57, %c0_58], %134 {strides = array<i32>} : memref<2x8x16xf32, #tpu.memory_space<vmem>>, vector<1x8x16xf32>,
    return
  }
}

</mosaic_0001>

<bundles_post_ra>
// kernel: tpu_custom_call.1
= control target key start
LH: loop header
LB: loop body
LE: loop exit
PB: predicated region body
PF: predicated region fallthrough
CT: control target
= control target key end

     0   :  { %v34_v1 = vlaneseq  ;;  %s824_s29 = smov 16   ;;  %v825_v2 = vmov 0.0|0.0   ;;  %vm826_vm0 = vmmov 0   ;;  %v827_v5 = vmov 0.0   ;;  %s1070_s0 = inlined_call_operand.vmem [shape: f32[2,4,16], index: 0, kind: input, shape index: {}]   ;;  %s1071_s1 = inlined_call_operand.vmem [shape: f32[16,12], index: 1, kind: input, shape index: {}]   ;;  %s1072_s2 = inlined_call_operand.vmem [shape: f32[8,1], index: 2, kind: input, shape index: {}]   ;;  %s1073_s3 = inlined_call_operand.vmem [shape: f32[8,1], index: 3, kind: input, shape index: {}]   ;;  %s1074_s4 = inlined_call_operand.vmem [shape: f32[8,24], index: 4, kind: input, shape index: {}]   ;;  %s1075_s5 = inlined_call_operand.vmem [shape: f32[8,1], index: 5, kind: input, shape index: {}]   ;;  %s1076_s6 = inlined_call_operand.vmem [shape: f32[8,1], index: 6, kind: input, shape index: {}]   ;;  %s1077_s7 = inlined_call_operand.vmem [shape: f32[8,1], index: 7, kind: input, shape index: {}]   ;;  %s1078_s8 = inlined_call_operand.hbm [shape: f32[2,8,16], index: 8, kind: output, shape index: {}]  }
   0x1   :  { %v637_v0 = vld [vmem:[%s1070_s0 + $0x4] sm:$0xf]  ;;  %750 = vmatprep.subr.bf16.mxu0 %v825_v2  ;;  %756 = vmatprep.subr.bf16.mxu1 %v825_v2 }
   0x2   :  { %88 = vrot.lane.b32.xlu0 %v637_v0, %s824_s29  ;;  %v35_v3 = vshrl.u32 %v34_v1, 7  ;;  %v40_v4 = vand.u32 127, %v34_v1  ;;  %698 = vmatprep.mubr.msk.f32.mxu0 %vm826_vm0, %v827_v5 }
   0x3   :  { %13 = vsyncpa [#allocation3], 0  ;;  %709 = vmatprep.mubr.msk.f32.mxu1 %vm826_vm0, %v827_v5  ;;  %v828_v20 = vmov 1.0|1.0   ;;  %v84_v26 = vld [vmem:[%s1070_s0] sm:$0xf] }
   0x4   :  { %v36_v6 = vadd.s32 8, %v35_v3  ;;  %v41_v7 = vadd.s32 1, %v35_v3  ;;  %v53_v8 = vand.u32 15, %v40_v4  ;;  %v70_v9 = vadd.s32 1, %v40_v4  ;;  %v30_v29 = vld [vmem:[%s1071_s1] sm:$0xff]  ;;  %v31_v37 = vld [vmem:[%s1071_s1 + $0x8] sm:$0xff] }
   0x5   :  { %v37_v10 = vadd.s32 16, %v35_v3  ;;  %v38_v11 = vadd.s32 24, %v35_v3  ;;  %v830_v43 = vmov 0   ;;  %v344_v52 = vld [vmem:[%s1072_s2] sm:$0xff] }
   0x6   :  { %v42_v12 = vadd.s32 1, %v36_v6  ;;  %vm45_vm1 = vcmp.eq.s32.totalorder %v40_v4, %v41_v7  ;;  %vm889_vm2 = vcmp.ne.s32.totalorder %v53_v8, 0  ;;  %vm71_vm3 = vcmp.eq.s32.totalorder %v35_v3, %v70_v9  ;;  %794 = vset.pattern.permute.xlu1 %v830_v43  ;;  %795 = vset.pattern.permute.xlu0 %v830_v43  ;;  %v348_v55 = vld [vmem:[%s1073_s3] sm:$0xff] }
   0x7   :  { %vm895_vm4 = vmand %vm45_vm1, %vm889_vm2  ;;  %vm899_vm5 = vcmp.ne.s32.totalorder %v53_v8, 15  ;;  %v43_v16 = vadd.s32 1, %v37_v10  ;;  %v44_v17 = vadd.s32 1, %v38_v11  ;;  %vm72_vm7 = vcmp.eq.s32.totalorder %v36_v6, %v70_v9  ;;  %v593_v19 = vld [vmem:[%s1075_s5] sm:$0xff]  ;;  %s831_s5 = smov 112  }
   0x8   :  { %vm46_vm6 = vcmp.eq.s32.totalorder %v40_v4, %v42_v12  ;;  %vm905_vm8 = vmand %vm71_vm3, %vm899_vm5  ;;  %vm73_vm1 = vcmp.eq.s32.totalorder %v37_v10, %v70_v9  ;;  %v597_v22 = vld [vmem:[%s1076_s6] sm:$0xff] }
   0x9   :  { %vm911_vm9 = vmand %vm46_vm6, %vm889_vm2  ;;  %vm47_vm11 = vcmp.eq.s32.totalorder %v40_v4, %v43_v16  ;;  %vm48_vm13 = vcmp.eq.s32.totalorder %v40_v4, %v44_v17  ;;  %vm74_vm6 = vcmp.eq.s32.totalorder %v38_v11, %v70_v9  ;;  %v32_v4 = vld [vmem:[%s1074_s4] sm:$0xff] }
   0xa   :  { %vm751_vm10 = vmpackc.low %vm911_vm9, %vm895_vm4  ;;  %vm239_vm4 = vcmask 1043456   ;;  %vm829_vm9 = vmmov 1  }
   0xb   :  { %752 = vmatpush3.bf16.msk.msra.mxu0 %vm751_vm10, %v828_v20  ;;  %vm926_vm12 = vmand %vm72_vm7, %vm899_vm5 }
   0xc   :  { %vm757_vm14 = vmpackc.low %vm926_vm12, %vm905_vm8  ;;  %753 = vmatprep.subr.bf16.mxu0 %v825_v2  ;;  %vm507_vm8 = vcmask 195584  }
   0xd   :  { %758 = vmatpush3.bf16.msk.msra.mxu1 %vm757_vm14, %v828_v20  ;;  %vm942_vm15 = vmand %vm47_vm11, %vm889_vm2 }
   0xe   :  { %759 = vmatprep.subr.bf16.mxu1 %v825_v2  ;;  %vm949_vm3 = vmand %vm48_vm13, %vm889_vm2 }
   0xf   :  { %vm754_vm7 = vmpackc.low %vm949_vm3, %vm942_vm15 }
  0x10   :  { %755 = vmatpush3.bf16.msk.msra.mxu0 %vm754_vm7, %v828_v20  ;;  %vm964_vm11 = vmand %vm73_vm1, %vm899_vm5  ;;  %vm91_vm1 = vcmask 130048  }
  0x11   :  { %vm970_vm2 = vmand %vm74_vm6, %vm899_vm5  ;;  %vm93_vm5 = vcmask 261120   ;;  %vm241_vm6 = vcmask 97280  }
  0x12   :  { %vm760_vm13 = vmpackc.low %vm970_vm2, %vm964_vm11 }
  0x13   :  { %761 = vmatpush3.bf16.msk.msra.mxu1 %vm760_vm13, %v828_v20 }
  0x14   :  { %768 = vmatprep.subr.bf16.mxu1 %v825_v2 }
  0x74   :  { %v89_v27 = vpop.permute.xlu0 %88 }
  0x75   :  { %v92_v28 = vsel %vm91_vm1, %v84_v26, %v89_v27 }
  0x76   :  { %699 = vmatmul.mubr.msk.f32.vlgmr.msra.gmra.mrb[0].mxu0 %vm93_vm5, %v92_v28  ;;  %710 = vmatmul.mubr.msk.f32.vlgmr.msra.gmra.mrb[0].mxu1 %vm93_vm5, %v92_v28  ;;  %v237_v30 = vrot.slane %v92_v28, 4 }
  0x77   :  { %770 = vmatpush3.bf16.msk.msra.mxu1 %vm751_vm10, %v828_v20  ;;  %727 = vmatprep.mubr.msk.f32.mxu1 %vm826_vm0, %v827_v5  ;;  %vm763_vm10 = vmpackc.low %vm239_vm4, %vm829_vm9 }
  0x78   :  { %771 = vmatprep.subr.bf16.mxu1 %v825_v2  ;;  %716 = vmatprep.mubr.msk.f32.mxu0 %vm241_vm6, %v30_v29 }
  0x7b   :  { %773 = vmatpush3.bf16.msk.msra.mxu1 %vm754_vm7, %v828_v20 }
  0x7c   :  { %780 = vmatprep.subr.bf16.mxu1 %v825_v2 }
 0x149   :  { %v163_v31 = vpop.f32.mrb[0].mxu0  ;;  %v233_v32 = vpop.f32.mrb[0].mxu1 }
 0x14a   :  { %v240_v33 = vsel %vm239_vm4, %v163_v31, %v237_v30  ;;  %v700_v34 = vpop.f32.mrb[1].mxu0  ;;  %v711_v35 = vpop.f32.mrb[1].mxu1 }
 0x14b   :  { %v762_v36 = vpack.c.bf16 %v233_v32, %v240_v33 }
 0x14d   :  { %764 = vmatprep.subr.msk.bf16.mxu0 %vm763_vm10, %v762_v36 }
 0x14e   :  { %767 = vmatpush3.bf16.msk.msra.mxu0 %vm763_vm10, %v762_v36 }
 0x14f   :  { %774 = vmatprep.subr.bf16.mxu0 %v825_v2 }
 0x151   :  { %717 = vmatmul.mubr.msk.f32.vlgmr.msra.gmra.mrb[2].mxu0 %vm241_vm6, %v31_v37 }
 0x152   :  { %776 = vmatpush3.bf16.msk.msra.mxu0 %vm757_vm14, %v828_v20  ;;  %738 = vmatprep.mubr.msk.f32.mxu0 %vm826_vm0, %v827_v5 }
 0x153   :  { %777 = vmatprep.subr.bf16.mxu0 %v825_v2 }
 0x156   :  { %779 = vmatpush3.bf16.msk.msra.mxu0 %vm760_vm13, %v828_v20 }
 0x224   :  { %v1026_v38 = vpop.f32.mrb[2].mxu0 }
 0x225   :  { %v317_v39 = vpop.f32.mrb[3].mxu0 }
 0x226   :  { %v332_v40 = vsel %vm93_vm5, %v317_v39, 0.0  ;;  %v335_v41 = vmul.f32 %v317_v39, %v317_v39 }
 0x227   :  { %333 = vadd.xlane.f32.xlu0 %v332_v40 }
 0x228   :  { %v336_v42 = vsel %vm93_vm5, %v335_v41, 0.0 }
 0x229   :  { %337 = vadd.xlane.f32.xlu1 %v336_v42 }
 0x2b4   :  { %v334_v44 = vpop.xlane.xlu0 %333 }
 0x2b5   :  { %v339_v45 = vmul.f32 0.03125, %v334_v44 }
 0x2b6   :  { %v338_v46 = vpop.xlane.xlu1 %337 }
 0x2b7   :  { %v341_v47 = vmul.f32 %v339_v45, %v339_v45  ;;  %v340_v48 = vmul.f32 0.03125, %v338_v46 }
 0x2b9   :  { %v342_v49 = vsub.f32 %v340_v48, %v341_v47 }
 0x2bb   :  { %v343_v50 = vmax.f32 %v342_v49, 0.0 }
 0x2bd   :  { %v345_v51 = vadd.f32 1e-05, %v343_v50 }
 0x2bf   :  { %796 = vrsqrt.f32 %v345_v51 }
 0x2c9   :  { %v797_v53 = vpop.eup %796 }
 0x2ca   :  { %v347_v54 = vmul.f32 %v797_v53, %v344_v52 }
 0x2cc   :  { %353 = vperm.xlu1 %794, %v347_v54   ;;  %v349_v56 = vmul.f32 %v347_v54, %v339_v45 }
 0x2ce   :  { %v350_v57 = vsub.f32 %v348_v55, %v349_v56 }
 0x2d0   :  { %359 = vperm.xlu1 %794, %v350_v57  }
 0x34b   :  { %v354_v58 = vpop.permute.xlu1 %353 }
 0x34c   :  { %v356_v59 = vmul.f32 %v354_v58, %v317_v39 }
 0x34f   :  { %v360_v60 = vpop.permute.xlu1 %359 }
 0x350   :  { %v362_v61 = vadd.f32 %v360_v60, %v356_v59 }
 0x352   :  { %v363_v62 = vmax.f32 %v362_v61, 0.0 }
 0x354   :  { %728 = vmatmul.mubr.msk.f32.vlgmr.msra.gmra.mrb[2].mxu1 %vm93_vm5, %v363_v62  ;;  %739 = vmatmul.mubr.msk.f32.vlgmr.msra.gmra.mrb[4].mxu0 %vm93_vm5, %v363_v62 }
 0x355   :  { %747 = vmatprep.mubr.msk.f32.mxu1 %vm826_vm0, %v827_v5 }
 0x427   :  { %v433_v63 = vpop.f32.mrb[2].mxu1  ;;  %v503_v0 = vpop.f32.mrb[4].mxu0 }
 0x428   :  { %v781_v1 = vpack.c.bf16 %v363_v62, %v433_v63  ;;  %v729_v2 = vpop.f32.mrb[3].mxu1  ;;  %v740_v3 = vpop.f32.mrb[5].mxu0 }
 0x42a   :  { %782 = vmatpush3.bf16.msra.mxu1 %v781_v1 }
 0x42b   :  { %745 = vmatprep.subr.mxu1 %v827_v5  ;;  %v33_v5 = vld [vmem:[%s1077_s7] sm:$0xff]  ;;  %s832_s7 = smov [#allocation2]  }
 0x42c   :  { %s626_s21 = sshll.u32 %s832_s7, 4  ;;  %s627_s21 = int_to_ptr.vmem [resolvable:$true] %s626_s21 }
 0x42d   :  { %s800_s6 = scalar_lea.vmem %s627_s21, 256  ;;  %p805_p1 = scmp.lt.s32.totalorder %s627_s21, %s627_s21 }
 0x42e   :  { %746 = vmatpush3.msra.mxu1 %v503_v0  ;;  %p801_p0 = scmp.ne.s32.totalorder %s627_s21, %s800_s6  ;;  %p806_p2 = scmp.lt.s32.totalorder %s800_s6, %s800_s6 }
 0x42f   :  { %748 = vmatmul.mubr.msk.f32.vlgmr.msra.gmra.mrb[4].mxu1 %vm507_vm8, %v32_v4 }
 0x430   :  { %p807_p3 = por %p806_p2, %p805_p1 }
 0x432   :  { %p808_p4 = pnand %p807_p3, %p801_p0 }
 0x502   :  { %v577_v6 = vpop.f32.mrb[4].mxu1 }
 0x503   :  { %v749_v7 = vpop.f32.mrb[5].mxu1  ;;  %v581_v8 = vsel %vm93_vm5, %v577_v6, 0.0  ;;  %v584_v9 = vmul.f32 %v577_v6, %v577_v6 }
 0x504   :  { %582 = vadd.xlane.f32.xlu1 %v581_v8 }
 0x505   :  { %v585_v10 = vsel %vm93_vm5, %v584_v9, 0.0 }
 0x506   :  { %586 = vadd.xlane.f32.xlu0 %v585_v10 }
 0x515   :  { %328 = vperm.xlu1 %794, %v33_v5  }
 0x591   :  { %v583_v11 = vpop.xlane.xlu1 %582 }
 0x592   :  { %v588_v12 = vmul.f32 0.03125, %v583_v11 }
 0x593   :  { %v587_v13 = vpop.xlane.xlu0 %586 }
 0x594   :  { %v590_v14 = vmul.f32 %v588_v12, %v588_v12  ;;  %v589_v15 = vmul.f32 0.03125, %v587_v13 }
 0x595   :  { %v329_v25 = vpop.permute.xlu1 %328 }
 0x596   :  { %v591_v16 = vsub.f32 %v589_v15, %v590_v14  ;;  %v331_v29 = vadd.f32 %v1026_v38, %v329_v25 }
 0x598   :  { %v592_v17 = vmax.f32 %v591_v16, 0.0 }
 0x59a   :  { %v594_v18 = vadd.f32 1e-05, %v592_v17 }
 0x59c   :  { %798 = vrsqrt.f32 %v594_v18 }
 0x5a6   :  { %v799_v20 = vpop.eup %798 }
 0x5a7   :  { %v596_v21 = vmul.f32 %v799_v20, %v593_v19 }
 0x5a9   :  { %602 = vperm.xlu0 %795, %v596_v21   ;;  %v598_v23 = vmul.f32 %v596_v21, %v588_v12 }
 0x5ab   :  { %v599_v24 = vsub.f32 %v597_v22, %v598_v23 }
 0x5ad   :  { %608 = vperm.xlu1 %794, %v599_v24  }
 0x628   :  { %v603_v26 = vpop.permute.xlu0 %602 }
 0x629   :  { %v605_v27 = vmul.f32 %v603_v26, %v577_v6 }
 0x62c   :  { %v609_v28 = vpop.permute.xlu1 %608 }
 0x62d   :  { %v611_v30 = vadd.f32 %v609_v28, %v605_v27 }
 0x62f   :  { %v612_v31 = vadd.f32 %v611_v30, %v331_v29 }
 0x631   :  { %v613_v32 = vmax.f32 %v612_v31, 0.0 }
 0x633   :  { %614 = vst.msk [vmem:[#allocation2] sm:$0xff] %vm91_vm1, %v613_v32  ;;  %616 = vrot.lane.b32.xlu1 %v613_v32, %s831_s5 }
 0x6a5   :  { %v617_v33 = vpop.permute.xlu1 %616 }
 0x6a6   :  { %620 = vst.msk [vmem:[#allocation2 + $0x8] sm:$0xff] %vm91_vm1, %v617_v33 }
 0x6a7   :  { %811 = shalt.err (!%p808_p4)
}
 0x6a8   :  { %s812_s24 = scalar_lea.hbm %s1078_s8, 256 }
 0x6a9   :  { %p813_p5 = scmp.ne.s32.totalorder %s1078_s8, %s812_s24  ;;  %p816_p6 = scmp.lt.u32.totalorder %s812_s24, %s1078_s8 }
 0x6ab   :  { %p818_p7 = pnand %p816_p6, %p813_p5 }
 0x6ad   :  { %821 = shalt.err (!%p818_p7)
}
 0x6ae   :  { %s833_s29 = smov 128   ;;  %s834_s30 = smov 8  }
 0x6af   :  { %632 = dma.vmem_to_hbm [thread:$0]  %s627_s21, 256, %s1078_s8, [#allocation3], %s833_s29, %s833_s29, %s834_s30  }
 0x6b0   :  { %822 = dma.done.wait [#allocation3], 256  }
 0x6b1   :  { %823 = vsyncadd [#allocation3], 4294967040 }
 0x6b2   :  { %636 = vsyncpa [#allocation3], 1 }

</bundles_post_ra>
